<compile_context>
chip_gen: v7x
topology: tpu7x:2x2x1
jax: 0.10.0
libtpu: 0.0.40
codegen_flags: <defaults>
</compile_context>

<pallas_src>
import functools

import jax
import jax.numpy as jnp
from jax import lax
from jax.experimental import pallas as pl
from jax.experimental.pallas import tpu as pltpu

_C = 512                  # lane width of the flattened view (multiple of 128)
_BR_MAX = 1024            # max block rows: 1024*512*4B = 2 MiB per f32 operand
_SINGLE_BLOCK_ROWS = 256  # below this, one full-extent block is cheapest
_TARGET_BLOCKS = 8        # aim for ~8 pipeline steps on larger inputs

_PASS_DTYPES = frozenset(
    jnp.dtype(d) for d in (jnp.float32, jnp.bfloat16, jnp.int8, jnp.uint8,
                           jnp.int32))


def _balance_bce_kernel(pred_ref, gt_ref, mask_ref, neg_loss_ref, stats_ref, *,
                        total_rows, block_rows, binary_gt, mask_tail):
    """One (block_rows, 512) tile: elementwise BCE + per-block partial stats."""
    pred = pred_ref[...].astype(jnp.float32)
    gt = gt_ref[...].astype(jnp.float32)
    msk = mask_ref[...].astype(jnp.float32)

    if mask_tail:
        # Ragged last block: rows >= total_rows hold stale VMEM garbage; mask
        # them with neutral values before any arithmetic (avoids NaN leaks).
        row = (pl.program_id(0) * block_rows
               + lax.broadcasted_iota(jnp.int32, pred.shape, 0))
        valid = row < total_rows
        pred = jnp.where(valid, pred, 0.5)
        gt = jnp.where(valid, gt, 0.0)
        msk = jnp.where(valid, msk, 0.0)

    # torch .byte() truncates toward zero; gt*mask is non-negative -> floor.
    positive = jnp.floor(gt * msk)
    negative = jnp.floor((1.0 - gt) * msk)

    if binary_gt:
        # Exactly equivalent to the two-log form when gt is {0,1}; halves the
        # transcendental (EUP) load per element.
        p_eff = jnp.where(gt >= 0.5, pred, 1.0 - pred)
        loss = -jnp.maximum(jnp.log(p_eff), -100.0)
    else:
        # torch binary_cross_entropy clamps the log terms at -100.
        log_p = jnp.maximum(jnp.log(pred), -100.0)
        log_1mp = jnp.maximum(jnp.log(1.0 - pred), -100.0)
        loss = -(gt * log_p + (1.0 - gt) * log_1mp)

    neg_loss_ref[...] = loss * negative

    s_pos_loss = jnp.sum(loss * positive)
    s_pos = jnp.sum(positive)
    s_neg = jnp.sum(negative)

    # Tiny per-block stats row; rides in otherwise-idle VPU slots (DMA-bound).
    lane = lax.broadcasted_iota(jnp.int32, (8, 128), 1)
    sub = lax.broadcasted_iota(jnp.int32, (8, 128), 0)
    first = sub == 0
    stats_ref[...] = (jnp.where(first & (lane == 0), s_pos_loss, 0.0)
                      + jnp.where(first & (lane == 1), s_pos, 0.0)
                      + jnp.where(first & (lane == 2), s_neg, 0.0))


def _round_up(x, m):
    return -(-x // m) * m


def _choose_blocking(rows):
    """Pick (block_rows, grid, needs_tail_mask) for a (rows, 512) view."""
    if rows <= _SINGLE_BLOCK_ROWS:
        return rows, 1, False          # single full-extent block
    br = min(_BR_MAX, max(64, _round_up(pl.cdiv(rows, _TARGET_BLOCKS), 16)))
    grid = pl.cdiv(rows, br)
    return br, grid, (rows % br) != 0


def _as_rows(x, rows, pad_value):
    """Flatten to (rows, 512), keeping the caller's (possibly narrow) dtype."""
    if x.dtype not in _PASS_DTYPES:
        x = x.astype(jnp.float32)
    flat = jnp.ravel(x)
    n_pad = rows * _C
    if n_pad != flat.shape[0]:
        # TODO(synk): this pad copies the operand; only hit when numel % 512 != 0.
        flat = jnp.pad(flat, (0, n_pad - flat.shape[0]),
                       constant_values=pad_value)
    return flat.reshape(rows, _C)


@functools.partial(jax.jit,
                   static_argnames=("negative_ratio", "eps", "binary_gt"))
def balance_cross_entropy_loss(pred, gt, mask, negative_ratio=3.0, eps=1e-6,
                               binary_gt=False):
    assert pred.shape == gt.shape == mask.shape
    n = pred.size
    rows = pl.cdiv(n, _C)
    block_rows, grid, mask_tail = _choose_blocking(rows)

    p2 = _as_rows(pred, rows, 0.5)   # 0.5 -> finite logs for padded elements
    g2 = _as_rows(gt, rows, 0)       # 0   -> neither positive nor negative
    m2 = _as_rows(mask, rows, 0)

    kernel = functools.partial(
        _balance_bce_kernel, total_rows=rows, block_rows=block_rows,
        binary_gt=binary_gt, mask_tail=mask_tail)

    data_spec = pl.BlockSpec((block_rows, _C), lambda i: (i, 0))
    neg_loss, stats = pl.pallas_call(
        kernel,
        grid=(grid,),
        in_specs=[data_spec, data_spec, data_spec],
        out_specs=[
            pl.BlockSpec((block_rows, _C), lambda i: (i, 0)),
            pl.BlockSpec((8, 128), lambda i: (i, 0)),
        ],
        out_shape=[
            jax.ShapeDtypeStruct((rows, _C), jnp.float32),
            jax.ShapeDtypeStruct((grid * 8, 128), jnp.float32),
        ],
        compiler_params=pltpu.CompilerParams(
            dimension_semantics=("parallel",),
            vmem_limit_bytes=32 * 1024 * 1024,
        ),
    )(p2, g2, m2)

    pos_loss_sum = jnp.sum(stats[:, 0])
    # Per-block counts are exact integers in f32 (block < 2^24 elems); finish
    # the accumulation in int32 to avoid drift on huge batches.
    positive_count = jnp.sum(jnp.round(stats[:, 1]).astype(jnp.int32))
    negative_total = jnp.sum(jnp.round(stats[:, 2]).astype(jnp.int32))
    negative_count = jnp.minimum(
        negative_total,
        (positive_count.astype(jnp.float32) * negative_ratio).astype(jnp.int32))

    # TODO(synk): data-dependent-k top-k has no exact Pallas/TPU primitive; an
    # in-kernel histogram select would need O(N*bins) VPU compares and inexact
    # tie handling, so the exact semantics are kept with one unstable XLA sort
    # + masked tail sum.  Extra zero entries from padding cannot change the
    # result because all BCE losses are >= 0.
    neg_flat = neg_loss.reshape(-1)
    total = neg_flat.shape[0]
    neg_sorted = lax.sort(neg_flat, is_stable=False)        # ascending
    idx = jnp.arange(total, dtype=jnp.int32)
    neg_loss_sum = jnp.sum(
        jnp.where(idx >= total - negative_count, neg_sorted, 0.0))

    return (pos_loss_sum + neg_loss_sum) / (
        (positive_count + negative_count).astype(jnp.float32) + eps)


def _reference(pred, gt, mask, negative_ratio=3.0, eps=1e-6):
    """Pure-JAX mirror of the PyTorch forward for validation."""
    positive = jnp.floor(gt * mask)
    negative = jnp.floor((1.0 - gt) * mask)
    positive_count = jnp.sum(positive).astype(jnp.int32)
    negative_count = jnp.minimum(
        jnp.sum(negative).astype(jnp.int32),
        (positive_count.astype(jnp.float32) * negative_ratio).astype(jnp.int32))
    loss = -(gt * jnp.maximum(jnp.log(pred), -100.0)
             + (1.0 - gt) * jnp.maximum(jnp.log(1.0 - pred), -100.0))
    positive_loss = loss * positive
    negative_loss = (loss * negative).reshape(-1)
    neg_sorted = jnp.sort(negative_loss)[::-1]
    idx = jnp.arange(neg_sorted.shape[0], dtype=jnp.int32)
    neg_sum = jnp.sum(jnp.where(idx < negative_count, neg_sorted, 0.0))
    return (jnp.sum(positive_loss) + neg_sum) / (
        (positive_count + negative_count).astype(jnp.float32) + eps)


def _make_inputs(key, shape):
    k1, k2, k3 = jax.random.split(key, 3)
    pred = jax.nn.sigmoid(jax.random.normal(k1, shape, dtype=jnp.float32))
    # Narrow dtypes for gt/mask (exact for 0/1 maps) -> less HBM traffic.
    gt = jax.random.bernoulli(k2, 0.3, shape).astype(jnp.bfloat16)
    mask = jax.random.bernoulli(k3, 0.8, shape).astype(jnp.bfloat16)
    return pred, gt, mask


if __name__ == "__main__":
    key = jax.random.PRNGKey(0)

    # (shape, binary_gt): primary small NCHW case on both log paths, a
    # numel-%512 != 0 case (padded-flat path), and a multi-block grid with a
    # ragged, in-kernel-masked last block.
    cases = [
        ((2, 4, 16, 16), False),
        ((2, 4, 16, 16), True),
        ((1, 1, 100, 70), False),
        ((1, 3, 200, 512), True),
    ]
    keys = jax.random.split(key, len(cases))
    for (shape, binary_gt), k in zip(cases, keys):
        pred, gt, mask = _make_inputs(k, shape)
        out = jax.block_until_ready(
            balance_cross_entropy_loss(pred, gt, mask, binary_gt=binary_gt))
        ref = jax.block_until_ready(
            _reference(pred, gt.astype(jnp.float32), mask.astype(jnp.float32)))
        assert jnp.allclose(out, ref, rtol=2e-4, atol=1e-5), (
            shape, binary_gt, out, ref)

    print("KERNEL_OK")
</pallas_src>

<mosaic_0001>
module attributes {stable_mosaic.version = 11 : i64} {
  func.func @_balance_bce_kernel(%arg0: i32, %arg1: memref<4x512xf32, #tpu.memory_space<vmem>>, %arg2: memref<4x512xbf16, #tpu.memory_space<vmem>>, %arg3: memref<4x512xbf16, #tpu.memory_space<vmem>>, %arg4: memref<4x512xf32, #tpu.memory_space<vmem>>, %arg5: memref<8x128xf32, #tpu.memory_space<vmem>>) attributes {dimension_semantics = [#tpu.dimension_semantics<parallel>], iteration_bounds = array<i64: 1>, scalar_prefetch = 0 : i64, scratch_operands = 0 : i64, tpu.core_type = #tpu.core_type<tc>, window_params = [{transform_indices = @transform_0, window_bounds = array<i64: 4, 512>}, {transform_indices = @transform_1, window_bounds = array<i64: 4, 512>}, {transform_indices = @transform_2, window_bounds = array<i64: 4, 512>}, {transform_indices = @transform_3, window_bounds = array<i64: 4, 512>}, {transform_indices = @transform_4, window_bounds = array<i64: 8, 128>}]} {
    %c0 = arith.constant 0 : index
    %c0_0 = arith.constant 0 : index
    %0 = vector.load %arg1[%c0, %c0_0] : memref<4x512xf32, #tpu.memory_space<vmem>>, vector<4x512xf32>
    %c0_1 = arith.constant 0 : index
    %c0_2 = arith.constant 0 : index
    %1 = vector.load %arg2[%c0_1, %c0_2] : memref<4x512xbf16, #tpu.memory_space<vmem>>, vector<4x512xbf16>
    %2 = arith.extf %1 : vector<4x512xbf16> to vector<4x512xf32>
    %c0_3 = arith.constant 0 : index
    %c0_4 = arith.constant 0 : index
    %3 = vector.load %arg3[%c0_3, %c0_4] : memref<4x512xbf16, #tpu.memory_space<vmem>>, vector<4x512xbf16>
    %4 = arith.extf %3 : vector<4x512xbf16> to vector<4x512xf32>
    %5 = arith.mulf %2, %4 : vector<4x512xf32>
    %6 = math.floor %5 : vector<4x512xf32>
    %cst = arith.constant 1.000000e+00 : f32
    %7 = vector.broadcast %cst : f32 to vector<4x512xf32>
    %8 = arith.subf %7, %2 : vector<4x512xf32>
    %9 = arith.mulf %8, %4 : vector<4x512xf32>
    %10 = math.floor %9 : vector<4x512xf32>
    %11 = math.log %0 : vector<4x512xf32>
    %cst_5 = arith.constant -1.000000e+02 : f32
    %12 = vector.broadcast %cst_5 : f32 to vector<4x512xf32>
    %13 = arith.maximumf %11, %12 : vector<4x512xf32>
    %cst_6 = arith.constant 1.000000e+00 : f32
    %14 = vector.broadcast %cst_6 : f32 to vector<4x512xf32>
    %15 = arith.subf %14, %0 : vector<4x512xf32>
    %16 = math.log %15 : vector<4x512xf32>
    %cst_7 = arith.constant -1.000000e+02 : f32
    %17 = vector.broadcast %cst_7 : f32 to vector<4x512xf32>
    %18 = arith.maximumf %16, %17 : vector<4x512xf32>
    %19 = arith.mulf %2, %13 : vector<4x512xf32>
    %cst_8 = arith.constant 1.000000e+00 : f32
    %20 = vector.broadcast %cst_8 : f32 to vector<4x512xf32>
    %21 = arith.subf %20, %2 : vector<4x512xf32>
    %22 = arith.mulf %21, %18 : vector<4x512xf32>
    %23 = arith.addf %19, %22 : vector<4x512xf32>
    %cst_9 = arith.constant 0.000000e+00 : f32
    %24 = vector.broadcast %cst_9 : f32 to vector<4x512xf32>
    %25 = arith.subf %24, %23 : vector<4x512xf32>
    %26 = arith.mulf %25, %10 : vector<4x512xf32>
    %c0_10 = arith.constant 0 : index
    %c0_11 = arith.constant 0 : index
    %27 = vector.load %arg4[%c0_10, %c0_11] : memref<4x512xf32, #tpu.memory_space<vmem>>, vector<4x512xf32>
    tpu.vector_store %arg4[%c0_10, %c0_11], %26 {strides = array<i32>} : memref<4x512xf32, #tpu.memory_space<vmem>>, vector<4x512xf32>,
    %28 = arith.mulf %25, %6 : vector<4x512xf32>
    %29 = vector.shape_cast %28 : vector<4x512xf32> to vector<1x4x512xf32>
    %cst_12 = arith.constant dense<0.000000e+00> : vector<1xf32>
    %30 = vector.multi_reduction <add>, %29, %cst_12 [1, 2] : vector<1x4x512xf32> to vector<1xf32>
    %31 = vector.shape_cast %30 : vector<1xf32> to vector<1x1x1xf32>
    %32 = vector.extract %31[0, 0, 0] : f32 from vector<1x1x1xf32>
    %33 = vector.shape_cast %6 : vector<4x512xf32> to vector<1x4x512xf32>
    %cst_13 = arith.constant dense<0.000000e+00> : vector<1xf32>
    %34 = vector.multi_reduction <add>, %33, %cst_13 [1, 2] : vector<1x4x512xf32> to vector<1xf32>
    %35 = vector.shape_cast %34 : vector<1xf32> to vector<1x1x1xf32>
    %36 = vector.extract %35[0, 0, 0] : f32 from vector<1x1x1xf32>
    %37 = vector.shape_cast %10 : vector<4x512xf32> to vector<1x4x512xf32>
    %cst_14 = arith.constant dense<0.000000e+00> : vector<1xf32>
    %38 = vector.multi_reduction <add>, %37, %cst_14 [1, 2] : vector<1x4x512xf32> to vector<1xf32>
    %39 = vector.shape_cast %38 : vector<1xf32> to vector<1x1x1xf32>
    %40 = vector.extract %39[0, 0, 0] : f32 from vector<1x1x1xf32>
    %41 = tpu.iota {dimensions = array<i32: 1>} : vector<8x128xi32>
    %42 = tpu.iota {dimensions = array<i32: 0>} : vector<8x128xi32>
    %c0_i32 = arith.constant 0 : i32
    %43 = vector.broadcast %c0_i32 : i32 to vector<8x128xi32>
    %44 = arith.cmpi eq, %42, %43 : vector<8x128xi32>
    %c0_i32_15 = arith.constant 0 : i32
    %45 = vector.broadcast %c0_i32_15 : i32 to vector<8x128xi32>
    %46 = arith.cmpi eq, %41, %45 : vector<8x128xi32>
    %47 = arith.andi %44, %46 : vector<8x128xi1>
    %cst_16 = arith.constant 0.000000e+00 : f32
    %48 = vector.broadcast %32 : f32 to vector<8x128xf32>
    %49 = vector.broadcast %cst_16 : f32 to vector<8x128xf32>
    %50 = arith.select %47, %48, %49 : vector<8x128xi1>, vector<8x128xf32>
    %c1_i32 = arith.constant 1 : i32
    %51 = vector.broadcast %c1_i32 : i32 to vector<8x128xi32>
    %52 = arith.cmpi eq, %41, %51 : vector<8x128xi32>
    %53 = arith.andi %44, %52 : vector<8x128xi1>
    %cst_17 = arith.constant 0.000000e+00 : f32
    %54 = vector.broadcast %36 : f32 to vector<8x128xf32>
    %55 = vector.broadcast %cst_17 : f32 to vector<8x128xf32>
    %56 = arith.select %53, %54, %55 : vector<8x128xi1>, vector<8x128xf32>
    %57 = arith.addf %50, %56 : vector<8x128xf32>
    %c2_i32 = arith.constant 2 : i32
    %58 = vector.broadcast %c2_i32 : i32 to vector<8x128xi32>
    %59 = arith.cmpi eq, %41, %58 : vector<8x128xi32>
    %60 = arith.andi %44, %59 : vector<8x128xi1>
    %cst_18 = arith.constant 0.000000e+00 : f32
    %61 = vector.broadcast %40 : f32 to vector<8x128xf32>
    %62 = vector.broadcast %cst_18 : f32 to vector<8x128xf32>
    %63 = arith.select %60, %61, %62 : vector<8x128xi1>, vector<8x128xf32>
    %64 = arith.addf %57, %63 : vector<8x128xf32>
    %c0_19 = arith.constant 0 : index
    %c0_20 = arith.constant 0 : index
    %65 = vector.load %arg5[%c0_19, %c0_20] : memref<8x128xf32, #tpu.memory_space<vmem>>, vector<8x128xf32>
    tpu.vector_store %arg5[%c0_19, %c0_20], %64 {strides = array<i32>} : memref<8x128xf32, #tpu.memory_space<vmem>>, vector<8x128xf32>,
    return
  }
  func.func @transform_0(%arg0: i32) -> (i32, i32) {
    %c0_i32 = arith.constant 0 : i32
    %c0_i32_0 = arith.constant 0 : i32
    return %arg0, %c0_i32 : i32, i32
  }
  func.func @transform_1(%arg0: i32) -> (i32, i32) {
    %c0_i32 = arith.constant 0 : i32
    %c0_i32_0 = arith.constant 0 : i32
    return %arg0, %c0_i32 : i32, i32
  }
  func.func @transform_2(%arg0: i32) -> (i32, i32) {
    %c0_i32 = arith.constant 0 : i32
    %c0_i32_0 = arith.constant 0 : i32
    return %arg0, %c0_i32 : i32, i32
  }
  func.func @transform_3(%arg0: i32) -> (i32, i32) {
    %c0_i32 = arith.constant 0 : i32
    %c0_i32_0 = arith.constant 0 : i32
    return %arg0, %c0_i32 : i32, i32
  }
  func.func @transform_4(%arg0: i32) -> (i32, i32) {
    %c0_i32 = arith.constant 0 : i32
    %c0_i32_0 = arith.constant 0 : i32
    return %arg0, %c0_i32 : i32, i32
  }
}

</mosaic_0001>

<bundles_post_ra>
// kernel: balance_cross_entropy_loss.1
= control target key start
LH: loop header
LB: loop body
LE: loop exit
PB: predicated region body
PF: predicated region fallthrough
CT: control target
= control target key end

     0   :  { %vm68_vm0 = vcmask 1043456   ;;  %s229_s1 = inlined_call_operand.vmem [shape: bf16[4,512], index: 1, kind: input, shape index: {}]   ;;  %s230_s2 = inlined_call_operand.vmem [shape: bf16[4,512], index: 2, kind: input, shape index: {}]   ;;  %s231_s0 = inlined_call_operand.vmem [shape: f32[4,512], index: 0, kind: input, shape index: {}]   ;;  %s232_s3 = inlined_call_operand.vmem [shape: f32[4,512], index: 3, kind: output, shape index: {0}]   ;;  %s233_s4 = inlined_call_operand.vmem [shape: f32[8,128], index: 4, kind: output, shape index: {1}]  }
   0x1   :  { %v18_v0 = vld [vmem:[%s229_s1] sm:$0xff]  ;;  %v17_v5 = vld [vmem:[%s231_s0 + $0x8] sm:$0xff] }
   0x2   :  { %v21_v1 = vld [vmem:[%s230_s2] sm:$0xff]  ;;  %v19_v3 = vunpack.c.l.bf16 %v18_v0  ;;  %v20_v4 = vunpack.c.h.bf16 %v18_v0  ;;  %v41_v11 = vsub.f32 1.0, %v17_v5 }
   0x3   :  { %v16_v2 = vld [vmem:[%s231_s0] sm:$0xff]  ;;  %v22_v6 = vunpack.c.l.bf16 %v21_v1  ;;  %v23_v8 = vunpack.c.h.bf16 %v21_v1 }
   0x4   :  { %163 = vlog2.f32 %v16_v2  ;;  %v40_v7 = vsub.f32 1.0, %v16_v2  ;;  %v28_v9 = vsub.f32 1.0, %v19_v3  ;;  %v29_v10 = vsub.f32 1.0, %v20_v4 }
   0x5   :  { %165 = vlog2.f32 %v17_v5  ;;  %v24_v32 = vmul.f32 %v22_v6, %v19_v3  ;;  %v25_v38 = vmul.f32 %v23_v8, %v20_v4 }
   0x6   :  { %v30_v12 = vmul.f32 %v28_v9, %v22_v6  ;;  %v31_v13 = vmul.f32 %v29_v10, %v23_v8  ;;  %167 = vlog2.f32 %v40_v7 }
   0x7   :  { %169 = vlog2.f32 %v41_v11  ;;  %v26_v41 = vfloor.f32 %v24_v32  ;;  %v27_v46 = vfloor.f32 %v25_v38 }
   0x8   :  { %v32_v14 = vfloor.f32 %v30_v12  ;;  %v33_v15 = vfloor.f32 %v31_v13 }
   0x9   :  { %v87_v45 = vcombine.high %v26_v41, %v26_v41  ;;  %v91_v52 = vsel %vm68_vm0, %v26_v41, 0.0  ;;  %v88_v62 = vcombine.high %v27_v46, %v27_v46  ;;  %v94_v63 = vsel %vm68_vm0, %v27_v46, 0.0 }
   0xa   :  { %v109_v16 = vcombine.high %v32_v14, %v32_v14  ;;  %v110_v17 = vcombine.high %v33_v15, %v33_v15  ;;  %v113_v18 = vsel %vm68_vm0, %v32_v14, 0.0  ;;  %v116_v20 = vsel %vm68_vm0, %v33_v15, 0.0 }
   0xb   :  { %v92_v53 = vsel %vm68_vm0, %v87_v45, 0.0 }
   0xc   :  { %v114_v19 = vsel %vm68_vm0, %v109_v16, 0.0  ;;  %v118_v23 = vsel %vm68_vm0, %v110_v17, 0.0  ;;  %v93_v59 = vadd.f32 %v92_v53, %v91_v52 }
   0xd   :  { %v115_v22 = vadd.f32 %v114_v19, %v113_v18 }
   0xe   :  { %v164_v21 = vpop.eup %163 }
   0xf   :  { %v35_v24 = vmul.f32 0.6931472, %v164_v21  ;;  %v166_v25 = vpop.eup %165  ;;  %v117_v26 = vadd.f32 %v116_v20, %v115_v22 }
  0x10   :  { %v37_v27 = vmul.f32 0.6931472, %v166_v25  ;;  %v168_v29 = vpop.eup %167 }
  0x11   :  { %v38_v28 = vmax.f32 %v35_v24, -100.0  ;;  %v119_v30 = vadd.f32 %v118_v23, %v117_v26  ;;  %v170_v31 = vpop.eup %169  ;;  %v43_v34 = vmul.f32 0.6931472, %v168_v29 }
  0x12   :  { %v39_v33 = vmax.f32 %v37_v27, -100.0  ;;  %v45_v35 = vmul.f32 0.6931472, %v170_v31 }
  0x13   :  { %120 = vadd.xlane.f32.xlu1 %v119_v30  ;;  %v46_v36 = vmax.f32 %v43_v34, -100.0  ;;  %v48_v37 = vmul.f32 %v38_v28, %v19_v3  ;;  %v95_v3 = vadd.f32 %v94_v63, %v93_v59  ;;  %v129_v28 = vlaneseq }
  0x14   :  { %v47_v39 = vmax.f32 %v45_v35, -100.0  ;;  %v49_v40 = vmul.f32 %v39_v33, %v20_v4  ;;  %v96_v4 = vsel %vm68_vm0, %v88_v62, 0.0 }
  0x15   :  { %v50_v42 = vmul.f32 %v46_v36, %v28_v9  ;;  %v97_v6 = vadd.f32 %v96_v4, %v95_v3  ;;  %v130_v29 = vand.u32 127, %v129_v28  ;;  %v132_v30 = vshrl.u32 %v129_v28, 7 }
  0x16   :  { %v51_v43 = vmul.f32 %v47_v39, %v29_v10 }
  0x17   :  { %v52_v44 = vadd.f32 %v50_v42, %v48_v37  ;;  %vm133_vm1 = vcmp.eq.s32.totalorder %v132_v30, 0  ;;  %vm134_vm2 = vcmp.eq.s32.totalorder %v130_v29, 0  ;;  %vm138_vm3 = vcmp.eq.s32.totalorder %v130_v29, 1 }
  0x18   :  { %v53_v47 = vadd.f32 %v51_v43, %v49_v40  ;;  %vm135_vm4 = vmand %vm133_vm1, %vm134_vm2  ;;  %vm143_vm5 = vcmp.eq.s32.totalorder %v130_v29, 2 }
  0x19   :  { %v54_v48 = vsub.f32 0.0, %v52_v44  ;;  %vm139_vm6 = vmand %vm133_vm1, %vm138_vm3 }
  0x1a   :  { %v55_v49 = vsub.f32 0.0, %v53_v47  ;;  %vm144_vm7 = vmand %vm133_vm1, %vm143_vm5 }
  0x1b   :  { %v60_v50 = vmul.f32 %v54_v48, %v26_v41  ;;  %v56_v51 = vmul.f32 %v54_v48, %v32_v14 }
  0x1c   :  { %v57_v54 = vmul.f32 %v55_v49, %v33_v15  ;;  %v61_v55 = vmul.f32 %v55_v49, %v27_v46 }
  0x1d   :  { %v64_v56 = vcombine.high %v60_v50, %v60_v50  ;;  %v69_v57 = vsel %vm68_vm0, %v60_v50, 0.0  ;;  %58 = vst [vmem:[%s232_s3] sm:$0xff] %v56_v51 }
  0x1e   :  { %59 = vst [vmem:[%s232_s3 + $0x8] sm:$0xff] %v57_v54  ;;  %v65_v58 = vcombine.high %v61_v55, %v61_v55  ;;  %v72_v61 = vsel %vm68_vm0, %v61_v55, 0.0 }
  0x1f   :  { %v70_v60 = vsel %vm68_vm0, %v64_v56, 0.0 }
  0x20   :  { %v71_v0 = vadd.f32 %v70_v60, %v69_v57  ;;  %v74_v1 = vsel %vm68_vm0, %v65_v58, 0.0 }
  0x22   :  { %v73_v2 = vadd.f32 %v72_v61, %v71_v0 }
  0x24   :  { %v75_v5 = vadd.f32 %v74_v1, %v73_v2 }
  0x26   :  { %76 = vadd.xlane.f32.xlu0 %v75_v5 }
  0x2a   :  { %98 = vadd.xlane.f32.xlu0 %v97_v6 }
  0xa0   :  { %v121_v7 = vpop.xlane.xlu1 %120 }
  0xa1   :  { %v122_v8 = vrot.slane %v121_v7, 4 }
  0xa3   :  { %v123_v9 = vadd.f32 %v122_v8, %v121_v7 }
  0xa5   :  { %v124_v13 = vrot.slane %v123_v9, 2 }
  0xa7   :  { %v125_v19 = vadd.f32 %v124_v13, %v123_v9 }
  0xa9   :  { %v126_v24 = vrot.slane %v125_v19, 1 }
  0xab   :  { %v127_v27 = vadd.f32 %v126_v24, %v125_v19 }
  0xb3   :  { %v77_v10 = vpop.xlane.xlu0 %76 }
  0xb4   :  { %v78_v11 = vrot.slane %v77_v10, 4 }
  0xb6   :  { %v79_v12 = vadd.f32 %v78_v11, %v77_v10 }
  0xb7   :  { %v99_v14 = vpop.xlane.xlu0 %98 }
  0xb8   :  { %v80_v15 = vrot.slane %v79_v12, 2  ;;  %v100_v16 = vrot.slane %v99_v14, 4 }
  0xba   :  { %v101_v17 = vadd.f32 %v100_v16, %v99_v14  ;;  %v81_v18 = vadd.f32 %v80_v15, %v79_v12 }
  0xbc   :  { %v102_v20 = vrot.slane %v101_v17, 2  ;;  %v82_v21 = vrot.slane %v81_v18, 1 }
  0xbe   :  { %v103_v22 = vadd.f32 %v102_v20, %v101_v17  ;;  %v83_v23 = vadd.f32 %v82_v21, %v81_v18 }
  0xc0   :  { %157 = vpush %v83_v23  ;;  %v104_v25 = vrot.slane %v103_v22, 1 }
  0xc2   :  { %v105_v26 = vadd.f32 %v104_v25, %v103_v22 }
  0xc4   :  { %159 = vpush %v105_v26 }
  0xc5   :  { %161 = vpush %v127_v27 }
  0xf1   :  { %s158_s3 = spop %157 }
  0xf2   :  { %v136_v31 = vstv %s158_s3 }
  0xf3   :  { %v137_v33 = vsel %vm135_vm4, %v136_v31, 0.0 }
  0xf5   :  { %s160_s24 = spop %159 }
  0xf6   :  { %v140_v32 = vstv %s160_s24  ;;  %s162_s25 = spop %161 }
  0xf7   :  { %v141_v34 = vsel %vm139_vm6, %v140_v32, 0.0  ;;  %v145_v35 = vstv %s162_s25 }
  0xf8   :  { %v142_v36 = vadd.f32 %v141_v34, %v137_v33  ;;  %v146_v37 = vsel %vm144_vm7, %v145_v35, 0.0 }
  0xfa   :  { %v147_v38 = vadd.f32 %v146_v37, %v142_v36 }
  0xfc   :  { %148 = vst [vmem:[%s233_s4] sm:$0xff] %v147_v38 }

</bundles_post_ra>
